<compile_context>
chip_gen: v5e
topology: v5e:2x2
jax: 0.10.0
libtpu: 0.0.40
codegen_flags: <defaults>
</compile_context>

<pallas_src>
import functools
import math

import jax
import jax.numpy as jnp
from jax.experimental import pallas as pl
from jax.experimental.pallas import tpu as pltpu


def _factor_proj_kernel(x_ref, w_ref, b_ref, o_ref, *,
                        relu_slope, eps, inv_ctot, bblk):
    # x_ref: (Bblk, Cin, tm)  input block, lanes = spatial, producer dtype as-is
    # w_ref: (Ctot, Cin)      pre-scaled equalized weight (resident, const index_map)
    # b_ref: (Ctot, 1)        bias (f32)
    # o_ref: (Bblk, Ctot, tm) output block (out_dtype)
    w = w_ref[...]
    b = b_ref[...]
    for i in range(bblk):                      # static unroll over blocked batch
        x = x_ref[i]                           # (Cin, tm)
        # 1x1 equalized conv == channel matmul; f32 accumulation on the MXU.
        y = jnp.dot(w, x, preferred_element_type=jnp.float32) + b
        # LeakyReLU(relu_slope), f32 VPU.
        y = jnp.where(y >= 0, y, relu_slope * y)
        # PixelNorm over the channel (sublane) axis:
        #   y / sqrt(mean(y^2, dim=C) + eps); mean = sum * (1/Ctot), static recip.
        ms = jnp.sum(y * y, axis=0, keepdims=True) * inv_ctot + eps
        o_ref[i] = (y * jax.lax.rsqrt(ms)).astype(o_ref.dtype)


@functools.partial(
    jax.jit,
    static_argnames=("out_channels", "out_size", "relu_slope", "eps",
                     "out_dtype", "target_lanes"))
def factor_projection_2d3d(x_nchw, weight, bias, *, out_channels, out_size,
                           relu_slope=0.2, eps=1e-8,
                           out_dtype=jnp.float32, target_lanes=1024):
    """x_nchw: (N, Cin, H, W) in the producer's dtype (f32 or bf16).
    weight: (Cout*out_size, Cin) raw (unscaled) 1x1 conv weight.
    bias: (Cout*out_size,). Returns (N, Cout, out_size, H, W) in out_dtype."""
    N, Cin, H, W = x_nchw.shape
    Ctot = weight.shape[0]
    assert Ctot == out_channels * out_size
    HW = H * W

    x_dtype = x_nchw.dtype
    x_item = jnp.dtype(x_dtype).itemsize
    out_item = jnp.dtype(out_dtype).itemsize

    # Equalized learning-rate scaling: w_eff = w * sqrt(2 / fan_in), fan_in = Cin.
    # Cast the (tiny) weight to the input dtype; never cast x in the wrapper.
    scale = math.sqrt(2.0 / Cin)
    w_eff = (weight.astype(jnp.float32) * scale).astype(x_dtype)   # (Ctot, Cin)
    b2d = bias.reshape(Ctot, 1).astype(jnp.float32)

    # Channel-first, spatial-last: pure reshape of NCHW (no transpose, no cast).
    x_flat = x_nchw.reshape(N, Cin, HW)

    # ---- VMEM budget & tile derivation (generation-aware) -------------------
    try:   # ~75% of physical VMEM (v5e/v6e: 128 MiB, v7x: 64 MiB)
        budget = int(pltpu.get_tpu_info().vmem_capacity_bytes) * 3 // 4
    except Exception:
        budget = 48 * 1024 * 1024              # safe fallback (fits v7x headroom)
    budget = min(budget, 96 * 1024 * 1024)

    resident = 2 * (Ctot * Cin * x_item + Ctot * 4)       # weight + bias (dbl-buf)
    per_lane = 2 * (Cin * x_item + Ctot * out_item)       # dbl-buf x + out per lane
    avail = max(budget // 2 - resident, per_lane * 128)   # 2x headroom for scratch
    budget_lanes = max(128, avail // per_lane)

    if HW > target_lanes:
        # Stream H*W in lane tiles (multiple of 128); one batch sample per step.
        bblk = 1
        tm_eff = max(128, (min(target_lanes, budget_lanes) // 128) * 128)
    else:
        # Small feature map: full H*W per step; block batch samples so each grid
        # step moves ~target_lanes lanes and the per-step overhead is amortized.
        tm_eff = HW
        bblk = int(max(1, min(N, target_lanes // HW, budget_lanes // HW, 8)))
        # Keep >= 2 parallel grid steps so both v7x TensorCores get work.
        if N >= 2 and (N + bblk - 1) // bblk < 2:
            bblk = max(1, (N + 1) // 2)
        elif N == 1 and HW >= 256:
            tm_eff = max(128, ((HW // 2 + 127) // 128) * 128)

    grid = (pl.cdiv(N, bblk), pl.cdiv(HW, tm_eff))

    # VMEM limit sized from the actual tile footprint (2x headroom), clamped to
    # the per-generation budget (never the full 64 MiB on v7x).
    est = (2 * bblk * Cin * tm_eff * x_item        # x block (double-buffered)
           + 2 * bblk * Ctot * tm_eff * out_item   # out block (double-buffered)
           + resident)                             # weight + bias
    vmem_limit = int(min(max(2 * est, 32 * 1024 * 1024), budget))

    kernel = functools.partial(_factor_proj_kernel, relu_slope=relu_slope,
                               eps=eps, inv_ctot=1.0 / Ctot, bblk=bblk)

    out_flat = pl.pallas_call(
        kernel,
        out_shape=jax.ShapeDtypeStruct((N, Ctot, HW), out_dtype),
        grid_spec=pltpu.PrefetchScalarGridSpec(
            num_scalar_prefetch=0,
            grid=grid,
            in_specs=[
                pl.BlockSpec((bblk, Cin, tm_eff), lambda b, s: (b, 0, s)),
                # Resident weight/bias: constant index_map, so no new DMA per step.
                # (Single-buffering via pl.Buffered(1) only matters for very large
                #  Ctot*Cin on v7x; left at default here.)
                pl.BlockSpec((Ctot, Cin), lambda b, s: (0, 0)),
                pl.BlockSpec((Ctot, 1), lambda b, s: (0, 0)),
            ],
            out_specs=pl.BlockSpec((bblk, Ctot, tm_eff), lambda b, s: (b, 0, s)),
        ),
        compiler_params=pltpu.CompilerParams(
            dimension_semantics=("parallel", "parallel"),
            vmem_limit_bytes=vmem_limit),
    )(x_flat, w_eff, b2d)

    # PyTorch: x.view(N, out_channels, -1, H, W) — a pure reshape, no data movement.
    return out_flat.reshape(N, out_channels, out_size, H, W)


if __name__ == "__main__":
    key = jax.random.PRNGKey(0)
    kx, kw = jax.random.split(key)

    # Small shapes consistent with the module's forward.
    N, Cin, H, W = 2, 4, 16, 16
    Cout, out_size = 8, 4
    Ctot = Cout * out_size

    x = jax.random.normal(kx, (N, Cin, H, W), dtype=jnp.float32)
    # EqualizedConv2d init: weight ~ N(0,1), shape (Ctot, Cin, 1, 1) -> (Ctot, Cin); bias = 0.
    weight = jax.random.normal(kw, (Ctot, Cin), dtype=jnp.float32)
    bias = jnp.zeros((Ctot,), dtype=jnp.float32)

    # Exact-semantics path (f32 in, f32 out) — matches the PyTorch module.
    out = factor_projection_2d3d(x, weight, bias,
                                 out_channels=Cout, out_size=out_size)
    out = jax.block_until_ready(out)

    # Pure-JAX reference (matches the PyTorch module).
    scale = math.sqrt(2.0 / Cin)
    y_ref = jnp.einsum('nchw,oc->nohw', x, weight * scale) + bias[None, :, None, None]
    y_ref = jnp.where(y_ref >= 0, y_ref, 0.2 * y_ref)
    y_ref = y_ref * jax.lax.rsqrt(jnp.mean(y_ref * y_ref, axis=1, keepdims=True) + 1e-8)
    ref = y_ref.reshape(N, Cout, out_size, H, W)

    assert out.shape == (N, Cout, out_size, H, W)
    assert out.dtype == jnp.float32
    assert jnp.allclose(out, ref, atol=1e-5, rtol=1e-5)

    # Reduced-precision path: producer emits bf16 activations and the consumer
    # accepts a bf16 result -> halves both dominant HBM streams (biggest win on
    # v5e/v6e). Epilogue stays f32 inside the kernel.
    out_bf16 = factor_projection_2d3d(x.astype(jnp.bfloat16), weight, bias,
                                      out_channels=Cout, out_size=out_size,
                                      out_dtype=jnp.bfloat16)
    out_bf16 = jax.block_until_ready(out_bf16)
    assert out_bf16.dtype == jnp.bfloat16
    assert jnp.allclose(out_bf16.astype(jnp.float32), ref, atol=6e-2, rtol=6e-2)

    print("KERNEL_OK")
</pallas_src>

<mosaic_0001>
module attributes {stable_mosaic.version = 11 : i64} {
  func.func @_factor_proj_kernel(%arg0: i32, %arg1: i32, %arg2: memref<1x4x256xf32, #tpu.memory_space<vmem>>, %arg3: memref<32x4xf32, #tpu.memory_space<vmem>>, %arg4: memref<32x1xf32, #tpu.memory_space<vmem>>, %arg5: memref<1x32x256xf32, #tpu.memory_space<vmem>>) attributes {dimension_semantics = [#tpu.dimension_semantics<parallel>, #tpu.dimension_semantics<parallel>], iteration_bounds = array<i64: 2, 1>, scalar_prefetch = 0 : i64, scratch_operands = 0 : i64, tpu.core_type = #tpu.core_type<tc>, window_params = [{transform_indices = @transform_0, window_bounds = array<i64: 1, 4, 256>}, {pipeline_mode = #tpu.pipeline_mode<synchronous>, transform_indices = @transform_1, window_bounds = array<i64: 32, 4>}, {pipeline_mode = #tpu.pipeline_mode<synchronous>, transform_indices = @transform_2, window_bounds = array<i64: 32, 1>}, {transform_indices = @transform_3, window_bounds = array<i64: 1, 32, 256>}]} {
    %c0 = arith.constant 0 : index
    %c0_0 = arith.constant 0 : index
    %0 = vector.load %arg3[%c0, %c0_0] : memref<32x4xf32, #tpu.memory_space<vmem>>, vector<32x4xf32>
    %c0_1 = arith.constant 0 : index
    %c0_2 = arith.constant 0 : index
    %1 = vector.load %arg4[%c0_1, %c0_2] : memref<32x1xf32, #tpu.memory_space<vmem>>, vector<32x1xf32>
    %c0_3 = arith.constant 0 : index
    %c0_4 = arith.constant 0 : index
    %c0_5 = arith.constant 0 : index
    %2 = vector.load %arg2[%c0_3, %c0_4, %c0_5] : memref<1x4x256xf32, #tpu.memory_space<vmem>>, vector<1x4x256xf32>
    %3 = vector.shape_cast %2 : vector<1x4x256xf32> to vector<4x256xf32>
    %cst = arith.constant dense<0.000000e+00> : vector<32x256xf32>
    %4 = tpu.matmul %0, %3, %cst {dimension_numbers = #tpu.dot_dimension_numbers<[1], [0], [0], [1], [0, 0, 1, 1], [], []>} : vector<32x4xf32>, vector<4x256xf32>, vector<32x256xf32> -> vector<32x256xf32>
    %5 = vector.broadcast %1 : vector<32x1xf32> to vector<32x256xf32>
    %6 = arith.addf %4, %5 : vector<32x256xf32>
    %cst_6 = arith.constant 0.000000e+00 : f32
    %7 = vector.broadcast %cst_6 : f32 to vector<32x256xf32>
    %8 = arith.cmpf oge, %6, %7 : vector<32x256xf32>
    %cst_7 = arith.constant 2.000000e-01 : f32
    %9 = vector.broadcast %cst_7 : f32 to vector<32x256xf32>
    %10 = arith.mulf %9, %6 : vector<32x256xf32>
    %11 = arith.select %8, %6, %10 : vector<32x256xi1>, vector<32x256xf32>
    %12 = arith.mulf %11, %11 : vector<32x256xf32>
    %cst_8 = arith.constant dense<0.000000e+00> : vector<256xf32>
    %13 = vector.multi_reduction <add>, %12, %cst_8 [0] : vector<32x256xf32> to vector<256xf32>
    %14 = vector.shape_cast %13 : vector<256xf32> to vector<1x256xf32>
    %cst_9 = arith.constant 3.125000e-02 : f32
    %15 = vector.broadcast %cst_9 : f32 to vector<1x256xf32>
    %16 = arith.mulf %14, %15 : vector<1x256xf32>
    %cst_10 = arith.constant 9.99999993E-9 : f32
    %17 = vector.broadcast %cst_10 : f32 to vector<1x256xf32>
    %18 = arith.addf %16, %17 : vector<1x256xf32>
    %19 = math.rsqrt %18 : vector<1x256xf32>
    %20 = vector.broadcast %19 : vector<1x256xf32> to vector<32x256xf32>
    %21 = arith.mulf %11, %20 : vector<32x256xf32>
    %c0_11 = arith.constant 0 : index
    %c0_12 = arith.constant 0 : index
    %c0_13 = arith.constant 0 : index
    %22 = vector.load %arg5[%c0_11, %c0_12, %c0_13] : memref<1x32x256xf32, #tpu.memory_space<vmem>>, vector<1x32x256xf32>
    %23 = vector.shape_cast %22 : vector<1x32x256xf32> to vector<32x256xf32>
    %24 = vector.shape_cast %21 : vector<32x256xf32> to vector<1x32x256xf32>
    tpu.vector_store %arg5[%c0_11, %c0_12, %c0_13], %24 {strides = array<i32>} : memref<1x32x256xf32, #tpu.memory_space<vmem>>, vector<1x32x256xf32>,
    return
  }
  func.func @transform_0(%arg0: i32, %arg1: i32) -> (i32, i32, i32) {
    %c0_i32 = arith.constant 0 : i32
    %c0_i32_0 = arith.constant 0 : i32
    return %arg0, %c0_i32, %arg1 : i32, i32, i32
  }
  func.func @transform_1(%arg0: i32, %arg1: i32) -> (i32, i32) {
    %c0_i32 = arith.constant 0 : i32
    %c0_i32_0 = arith.constant 0 : i32
    %c0_i32_1 = arith.constant 0 : i32
    return %c0_i32, %c0_i32_0 : i32, i32
  }
  func.func @transform_2(%arg0: i32, %arg1: i32) -> (i32, i32) {
    %c0_i32 = arith.constant 0 : i32
    %c0_i32_0 = arith.constant 0 : i32
    %c0_i32_1 = arith.constant 0 : i32
    return %c0_i32, %c0_i32_0 : i32, i32
  }
  func.func @transform_3(%arg0: i32, %arg1: i32) -> (i32, i32, i32) {
    %c0_i32 = arith.constant 0 : i32
    %c0_i32_0 = arith.constant 0 : i32
    return %arg0, %c0_i32, %arg1 : i32, i32, i32
  }
}

</mosaic_0001>

<bundles_post_ra>
// kernel: factor_projection_2d3d.1
= control target key start
LH: loop header
LB: loop body
LE: loop exit
PB: predicated region body
PF: predicated region fallthrough
CT: control target
= control target key end

     0   :  { %s597_s12 = smov 0   ;;  %s599_s13 = smov 0   ;;  %s691_s0 = inlined_call_operand.vmem [shape: f32[2,4,256], index: 0, kind: input, shape index: {}]   ;;  %s692_s1 = inlined_call_operand.vmem [shape: f32[32,4], index: 1, kind: input, shape index: {}]   ;;  %s693_s2 = inlined_call_operand.vmem [shape: f32[32,1], index: 2, kind: input, shape index: {}]   ;;  %s694_s3 = inlined_call_operand.vmem [shape: f32[2,32,256], index: 3, kind: output, shape index: {}]  }
   0x1   :  { %s601_s14 = smov 0  }
   0x2 LB: > { %s25_s15 = sadd.s32 1, %s570_s13  ;;  %p500_p0 = scmp.ge.s32.totalorder %s574_s14, 1  ;;  %s574_s14 = sphi %s601_s14, %s13_s14   ;;  %s570_s13 = sphi %s599_s13, %s696_s13   ;;  %s566_s12 = sphi %s597_s12, %s695_s12  }
   0x3   : > { %p27_p1 = scmp.ge.s32.totalorder %s25_s15, 2  ;;  %p158_p2 = scmp.lt.s32.totalorder %s574_s14, 3 }
   0x5   : > { %s698_s15 = smov (%p27_p1, %s25_s15), 0  ;;  %p159_p3 = pnand %p500_p0, %p158_p2 }
   0x6   : > { %p191_p4 = scmp.lt.s32.totalorder (!%p159_p3), %s566_s12, 1 }
   0x7   : > { %162 = sbr.rel (%p159_p3) target bundleno = 219 (0xdb), region = 32 }
   0xc   : > { %v576_v0 = vmov 0   ;;  %v214_v1 = vld [vmem:[%s693_s2] sm:$0xff]  ;;  %s700_s12 = smov (!%p191_p4, %s566_s12), 1  ;;  %v216_v2 = vld [vmem:[%s693_s2 + $0x10] sm:$0xff]  ;;  %v215_v4 = vld [vmem:[%s693_s2 + $0x8] sm:$0xff]  ;;  %vm256_vm0 = vcmask 1043456  }
   0xd   : > { %546 = vset.pattern.permute.xlu0 %v576_v0  ;;  %547 = vset.pattern.permute.xlu1 %v576_v0  ;;  %s517_s20 = sshll.u32 %s700_s12, 3  ;;  %v217_v5 = vld [vmem:[%s693_s2 + $0x18] sm:$0xff]  ;;  %v210_v6 = vld [vmem:[%s692_s1] sm:$0xff]  ;;  %vm243_vm1 = vcmask 31744   ;;  %v212_v7 = vld [vmem:[%s692_s1 + $0x10] sm:$0xff]  ;;  %s518_s9 = sshll.u32 %s700_s12, 6 }
   0xe   : > { %221 = vperm.xlu0 %546, %v214_v1   ;;  %231 = vperm.xlu1 %547, %v216_v2   ;;  %s198_s23 = scalar_lea.vmem %s691_s0, %s517_s20  ;;  %v211_v10 = vld [vmem:[%s692_s1 + $0x8] sm:$0xff]  ;;  %v213_v11 = vld [vmem:[%s692_s1 + $0x18] sm:$0xff]  ;;  %s208_s16 = scalar_lea.vmem %s694_s3, %s518_s9 }
   0xf   : > { %v218_v3 = vld [vmem:[%s198_s23] sm:$0xff] }
  0x10   : > { %240 = vst [vmem:[#allocation1] ss:$2 sm:$0xff] %v218_v3 }
  0x16   : > { %226 = vperm.xlu0 %546, %v215_v4   ;;  %236 = vperm.xlu1 %547, %v217_v5  }
  0x17   : > { %v241_v8 = vld.sshfl [vmem:[#allocation1] sm:$0xff pattern:$0x75316420]  ;;  %v242_v9 = vld.sshfl [vmem:[#allocation1 + $0x8] sm:$0xff pattern:$0x75316420] }
  0x18   : > { %505 = vmatpush.msk.msra.mxu0 %vm256_vm0, %v241_v8  ;;  %519 = vmatpush.msk.msra.mxu2 %vm256_vm0, %v241_v8 }
  0x19   : > { %510 = vmatpush.msk.msra.mxu1 %vm256_vm0, %v242_v9  ;;  %520 = vmatpush.msk.msra.mxu3 %vm256_vm0, %v242_v9 }
  0x1a   : > { %506 = vmatmul.msk.f32.vlgmr.msra.gmra.mxu0 %vm243_vm1, %v210_v6  ;;  %508 = vmatmul.msk.f32.vlgmr.msra.gmra.mxu2 %vm243_vm1, %v212_v7 }
  0x1b   : > { %511 = vmatmul.msk.f32.vlgmr.msra.gmra.mxu1 %vm243_vm1, %v210_v6  ;;  %513 = vmatmul.msk.f32.vlgmr.msra.gmra.mxu3 %vm243_vm1, %v212_v7 }
  0x22   : > { %507 = vmatmul.msk.f32.gmra.mxu0 %vm243_vm1, %v211_v10  ;;  %509 = vmatmul.msk.f32.gmra.mxu2 %vm243_vm1, %v213_v11 }
  0x23   : > { %512 = vmatmul.msk.f32.gmra.mxu1 %vm243_vm1, %v211_v10  ;;  %514 = vmatmul.msk.f32.gmra.mxu3 %vm243_vm1, %v213_v11 }
  0x80   : > { %v222_v12 = vpop.permute.xlu0 %221  ;;  %v232_v17 = vpop.permute.xlu1 %231 }
  0x88   : > { %v227_v23 = vpop.permute.xlu0 %226  ;;  %v237_v37 = vpop.permute.xlu1 %236 }
  0x97   : > { %v278_v13 = vpop.f32.mrf.mxu0 }
  0x98   : > { %v307_v14 = vpop.f32.mrf.mxu1  ;;  %v279_v15 = vadd.f32 %v278_v13, %v222_v12 }
  0x99   : > { %v308_v16 = vadd.f32 %v307_v14, %v222_v12 }
  0x9a   : > { %v327_v18 = vmul.f32 0.2, %v279_v15  ;;  %vm319_vm2 = vcmp.ge.f32.partialorder %v279_v15, 0.0 }
  0x9b   : > { %v328_v20 = vmul.f32 0.2, %v308_v16  ;;  %vm320_vm3 = vcmp.ge.f32.partialorder %v308_v16, 0.0 }
  0x9c   : > { %v653_v28 = vsel %vm319_vm2, %v279_v15, %v327_v18 }
  0x9d   : > { %v284_v19 = vpop.f32.mrf.mxu2  ;;  %v655_v30 = vsel %vm320_vm3, %v308_v16, %v328_v20  ;;  %v343_v36 = vmul.f32 %v653_v28, %v653_v28 }
  0x9e   : > { %v285_v21 = vadd.f32 %v284_v19, %v232_v17  ;;  %v313_v22 = vpop.f32.mrf.mxu3  ;;  %v344_v41 = vmul.f32 %v655_v30, %v655_v30 }
  0x9f   : > { %v314_v24 = vadd.f32 %v313_v22, %v232_v17  ;;  %v281_v25 = vpop.f32.mrf.mxu0 }
  0xa0   : > { %v282_v26 = vadd.f32 %v281_v25, %v227_v23  ;;  %v310_v27 = vpop.f32.mrf.mxu1  ;;  %v331_v31 = vmul.f32 0.2, %v285_v21  ;;  %vm323_vm5 = vcmp.ge.f32.partialorder %v285_v21, 0.0 }
  0xa1   : > { %v311_v29 = vadd.f32 %v310_v27, %v227_v23  ;;  %v332_v33 = vmul.f32 0.2, %v314_v24  ;;  %vm324_vm7 = vcmp.ge.f32.partialorder %v314_v24, 0.0 }
  0xa2   : > { %vm321_vm4 = vcmp.ge.f32.partialorder %v282_v26, 0.0  ;;  %v329_v32 = vmul.f32 0.2, %v282_v26  ;;  %v339_v42 = vsel %vm323_vm5, %v285_v21, %v331_v31 }
  0xa3   : > { %vm322_vm6 = vcmp.ge.f32.partialorder %v311_v29, 0.0  ;;  %v330_v34 = vmul.f32 0.2, %v311_v29  ;;  %v669_v46 = vsel %vm324_vm7, %v314_v24, %v332_v33  ;;  %v347_v51 = vmul.f32 %v339_v42, %v339_v42 }
  0xa4   : > { %v657_v35 = vsel %vm321_vm4, %v282_v26, %v329_v32  ;;  %v348_v53 = vmul.f32 %v669_v46, %v669_v46 }
  0xa5   : > { %v345_v38 = vmul.f32 %v657_v35, %v657_v35  ;;  %v663_v39 = vsel %vm322_vm6, %v311_v29, %v330_v34  ;;  %v287_v40 = vpop.f32.mrf.mxu2 }
  0xa6   : > { %v346_v43 = vmul.f32 %v663_v39, %v663_v39  ;;  %v288_v44 = vadd.f32 %v287_v40, %v237_v37  ;;  %v316_v45 = vpop.f32.mrf.mxu3 }
  0xa7   : > { %v351_v47 = vadd.f32 %v345_v38, %v343_v36  ;;  %v317_v48 = vadd.f32 %v316_v45, %v237_v37 }
  0xa8   : > { %v360_v49 = vadd.f32 %v346_v43, %v344_v41  ;;  %vm325_vm8 = vcmp.ge.f32.partialorder %v288_v44, 0.0  ;;  %v333_v50 = vmul.f32 0.2, %v288_v44 }
  0xa9   : > { %vm326_vm9 = vcmp.ge.f32.partialorder %v317_v48, 0.0  ;;  %v334_v52 = vmul.f32 0.2, %v317_v48  ;;  %v352_v56 = vadd.f32 %v351_v47, %v347_v51 }
  0xaa   : > { %v341_v54 = vsel %vm325_vm8, %v288_v44, %v333_v50  ;;  %v361_v59 = vadd.f32 %v360_v49, %v348_v53 }
  0xab   : > { %v349_v55 = vmul.f32 %v341_v54, %v341_v54  ;;  %v342_v57 = vsel %vm326_vm9, %v317_v48, %v334_v52 }
  0xac   : > { %v350_v58 = vmul.f32 %v342_v57, %v342_v57 }
  0xad   : > { %v353_v60 = vadd.f32 %v352_v56, %v349_v55 }
  0xae   : > { %v362_v61 = vadd.f32 %v361_v59, %v350_v58 }
  0xaf   : > { %v354_v62 = vrot.slane %v353_v60, 4 }
  0xb0   : > { %v363_v63 = vrot.slane %v362_v61, 4 }
  0xb1   : > { %v355_v0 = vadd.f32 %v354_v62, %v353_v60 }
  0xb2   : > { %v364_v1 = vadd.f32 %v363_v63, %v362_v61 }
  0xb3   : > { %v356_v2 = vrot.slane %v355_v0, 2 }
  0xb4   : > { %v365_v3 = vrot.slane %v364_v1, 2 }
  0xb5   : > { %v357_v4 = vadd.f32 %v356_v2, %v355_v0 }
  0xb6   : > { %v366_v5 = vadd.f32 %v365_v3, %v364_v1 }
  0xb7   : > { %v358_v6 = vrot.slane %v357_v4, 1 }
  0xb8   : > { %v367_v7 = vrot.slane %v366_v5, 1 }
  0xb9   : > { %v359_v8 = vadd.f32 %v358_v6, %v357_v4 }
  0xba   : > { %v368_v9 = vadd.f32 %v367_v7, %v366_v5 }
  0xbb   : > { %v369_v10 = vmul.f32 0.03125, %v359_v8 }
  0xbc   : > { %v370_v11 = vmul.f32 0.03125, %v368_v9 }
  0xbd   : > { %v371_v12 = vadd.f32 1e-08, %v369_v10 }
  0xbe   : > { %v372_v13 = vadd.f32 1e-08, %v370_v11 }
  0xbf   : > { %548 = vrsqrt.f32 %v371_v12  ;;  %vm379_vm11 = vweird.f32 %v371_v12 }
  0xc0   : > { %550 = vrsqrt.f32 %v372_v13  ;;  %vm389_vm14 = vweird.f32 %v372_v13 }
  0xc5   : > { %v549_v14 = vpop.eup %548 }
  0xc6   : > { %v551_v15 = vpop.eup %550  ;;  %v374_v16 = vmul.f32 %v549_v14, %v371_v12  ;;  %vm380_vm10 = vweird.f32 %v549_v14 }
  0xc7   : > { %v384_v17 = vmul.f32 %v551_v15, %v372_v13  ;;  %vm390_vm12 = vweird.f32 %v551_v15  ;;  %vm381_vm13 = vmor %vm379_vm11, %vm380_vm10 }
  0xc8   : > { %v375_v18 = vmul.f32 %v549_v14, %v374_v16  ;;  %vm391_vm15 = vmor %vm389_vm14, %vm390_vm12 }
  0xc9   : > { %v385_v19 = vmul.f32 %v551_v15, %v384_v17 }
  0xca   : > { %v376_v20 = vmul.f32 0.5, %v375_v18 }
  0xcb   : > { %v386_v21 = vmul.f32 0.5, %v385_v19 }
  0xcc   : > { %v377_v22 = vsub.f32 1.5, %v376_v20 }
  0xcd   : > { %v387_v23 = vsub.f32 1.5, %v386_v21 }
  0xce   : > { %v378_v24 = vmul.f32 %v549_v14, %v377_v22 }
  0xcf   : > { %v388_v25 = vmul.f32 %v551_v15, %v387_v23 }
  0xd0   : > { %v382_v26 = vsel %vm381_vm13, %v549_v14, %v378_v24 }
  0xd1   : > { %v393_v27 = vmul.f32 %v382_v26, %v653_v28  ;;  %v395_v29 = vmul.f32 %v382_v26, %v657_v35  ;;  %v397_v31 = vmul.f32 %v382_v26, %v339_v42  ;;  %v399_v32 = vmul.f32 %v382_v26, %v341_v54 }
  0xd2   : > { %v392_v33 = vsel %vm391_vm15, %v551_v15, %v388_v25 }
  0xd3   : > { %401 = vst [vmem:[%s208_s16] sm:$0xff] %v393_v27  ;;  %v394_v34 = vmul.f32 %v392_v33, %v655_v30  ;;  %v396_v36 = vmul.f32 %v392_v33, %v663_v39  ;;  %v398_v37 = vmul.f32 %v392_v33, %v669_v46  ;;  %v400_v38 = vmul.f32 %v392_v33, %v342_v57 }
  0xd4   : > { %403 = vst [vmem:[%s208_s16 + $0x10] sm:$0xff] %v395_v29 }
  0xd5   : > { %405 = vst [vmem:[%s208_s16 + $0x20] sm:$0xff] %v397_v31 }
  0xd6   : > { %407 = vst [vmem:[%s208_s16 + $0x30] sm:$0xff] %v399_v32 }
  0xd7   : > { %402 = vst [vmem:[%s208_s16 + $0x8] sm:$0xff] %v394_v34 }
  0xd8   : > { %404 = vst [vmem:[%s208_s16 + $0x18] sm:$0xff] %v396_v36 }
  0xd9   : > { %406 = vst [vmem:[%s208_s16 + $0x28] sm:$0xff] %v398_v37 }
  0xda   : > { %408 = vst [vmem:[%s208_s16 + $0x38] sm:$0xff] %v400_v38 }
  0xdb PF: > { %s13_s14 = sadd.s32 1, %s574_s14   ;;  %s695_s12 = smov %s570_s13 }
  0xdc   : > { %p10_p5 = scmp.ge.s32.totalorder %s13_s14, 4   ;;  %s696_s13 = smov %s698_s15 }
  0xde   :  { %12 = sbr.rel (!%p10_p5) target bundleno = 2 (0x2), region = 62 }

</bundles_post_ra>
